<compile_context>
chip_gen: v7x
topology: tpu7x:2x2x1
jax: 0.10.0
libtpu: 0.0.40
codegen_flags: <defaults>
</compile_context>

<pallas_src>
import functools

import jax
import jax.numpy as jnp
from jax import lax
from jax.experimental import pallas as pl
from jax.experimental.pallas import tpu as pltpu


# ----------------------------------------------------------------------- helpers
def _round_up(x, m):
    return ((x + m - 1) // m) * m


def _pad_axis(a, size, axis, value=0):
    pad = size - a.shape[axis]
    if pad <= 0:
        return a
    widths = [(0, 0)] * a.ndim
    widths[axis] = (0, pad)
    return jnp.pad(a, widths, constant_values=value)


def _device_rel_cfg():
    """(tile_r, vmem_limit_bytes) per TPU generation."""
    try:
        kind = jax.devices()[0].device_kind.lower()
    except Exception:
        kind = ""
    if "v7" in kind:                      # 64 MiB VMEM / TC, 2 TCs
        return 128, 56 * 1024 * 1024
    if "v5" in kind or "v6" in kind:      # 128 MiB VMEM
        return 512, 96 * 1024 * 1024
    return 256, 48 * 1024 * 1024          # conservative default (v3/v4/unknown)


# ------------------------------------------------------------- kernel 1: objects
def _obj_side_kernel(roi_ref, w_objc_ref, b_objc_ref, w_ctxe_ref, b_ctxe_ref,
                     w_head_ref, b_head_ref, w_tail_ref, b_tail_ref,
                     obj_dists_ref, head_ref, tail_ref):
    f32, bf16 = jnp.float32, jnp.bfloat16
    roi = roi_ref[...]                                               # bf16 (n_obj_p, C)

    # object classifier (context-layer stand-in), 128-lane padded output
    obj_dists_ref[...] = (jnp.dot(roi, w_objc_ref[...], preferred_element_type=f32)
                          + b_objc_ref[...])

    # edge-context encoder (context-layer stand-in)
    edge_ctx = (jnp.dot(roi, w_ctxe_ref[...], preferred_element_type=f32)
                + b_ctxe_ref[...]).astype(bf16)

    # post_emb split into head / tail halves (no lane-axis slice needed)
    head = jnp.dot(edge_ctx, w_head_ref[...], preferred_element_type=f32) + b_head_ref[...]
    tail = jnp.dot(edge_ctx, w_tail_ref[...], preferred_element_type=f32) + b_tail_ref[...]
    head_ref[...] = head.astype(bf16)
    tail_ref[...] = tail.astype(bf16)


# ------------------------------------------------------------ kernel 2: rel pairs
def _rel_side_kernel(pair_ref, uni_ref, head_ref, tail_ref,
                     w_h_ref, w_t_ref, b_gate_ref,
                     w_up_ref, b_up_ref,
                     w_rel_ref, b_rel_ref,
                     rel_dists_ref, *, pool_p):
    f32, bf16 = jnp.float32, jnp.bfloat16
    tile_r = pair_ref.shape[0]
    n_obj = head_ref.shape[0]

    pair = pair_ref[...]                                             # (tile_r, 2) int32
    obj_iota = lax.broadcasted_iota(jnp.int32, (tile_r, n_obj), 1)
    onehot_s = (obj_iota == pair[:, 0:1]).astype(bf16)
    onehot_o = (obj_iota == pair[:, 1:2]).astype(bf16)
    # one-hot gather on the MXU; bf16 output is exact (selects bf16 rows)
    head_bf = jnp.dot(onehot_s, head_ref[...], preferred_element_type=bf16)  # (tile_r, H)
    tail_bf = jnp.dot(onehot_o, tail_ref[...], preferred_element_type=bf16)

    # fused [post_cat | ctx_compress] matmuls: one dot per head/tail half.
    # Columns [:pool_p] are the ctx gate; columns [pool_p:] are prod @ w_ctx_compress.
    fused = (jnp.dot(head_bf, w_h_ref[...], preferred_element_type=f32)
             + jnp.dot(tail_bf, w_t_ref[...], preferred_element_type=f32))
    ctx_gate = fused[:, :pool_p] + b_gate_ref[...]
    ctx_logits = fused[:, pool_p:]

    # up_dim on union features (union_single_not_match path), visual gating in f32
    uni_up = (jnp.dot(uni_ref[...], w_up_ref[...], preferred_element_type=f32)
              + b_up_ref[...])
    visual = (ctx_gate * uni_up).astype(bf16)

    # rel_dists = rel_compress(visual) + ctx_compress(prod); both biases pre-folded
    rel_dists_ref[...] = (jnp.dot(visual, w_rel_ref[...], preferred_element_type=f32)
                          + ctx_logits + b_rel_ref[...]).astype(rel_dists_ref.dtype)


# ----------------------------------------------------------------------- wrapper
def trans_like_predictor_forward(roi_features, rel_pair_idxs, union_features,
                                 num_objs, num_rels, params, *, tile_r=None,
                                 vmem_limit_bytes=None):
    """Eval-mode forward. Returns (obj_dists_per_image, rel_dists_per_image, {})."""
    f32, bf16 = jnp.float32, jnp.bfloat16

    tile_r_default, vmem_default = _device_rel_cfg()
    if tile_r is None:
        tile_r = tile_r_default
    if vmem_limit_bytes is None:
        vmem_limit_bytes = vmem_default

    # glue: flatten per-image local pair indices into global object row indices
    offsets, acc = [], 0
    for n in num_objs:
        offsets.append(acc)
        acc += n
    sidx = jnp.concatenate([p[:, 0] + o for p, o in zip(rel_pair_idxs, offsets)]).astype(jnp.int32)
    oidx = jnp.concatenate([p[:, 1] + o for p, o in zip(rel_pair_idxs, offsets)]).astype(jnp.int32)
    pair = jnp.stack([sidx, oidx], axis=1)                    # (n_rel, 2) int32

    n_obj = roi_features.shape[0]
    n_rel = int(pair.shape[0])
    hidden = params['w_ctx_enc'].shape[1]
    pooling = params['w_post_cat'].shape[1]
    mlp = params['w_up_dim'].shape[0]
    num_obj_cls = params['w_obj_cls'].shape[1]
    num_rel_cls = params['w_rel'].shape[1]

    # padding: 16-row bf16 sublane packing for objects, tile-align rel pairs,
    # 128-lane-align the pooling and class dims
    n_obj_p = max(_round_up(n_obj, 16), 16)
    obj_c_p = _round_up(num_obj_cls, 128)
    rel_c_p = _round_up(num_rel_cls, 128)
    pool_p = _round_up(pooling, 128)

    # clamp tile to problem size (keeps >= 2 tiles on v7x when n_rel is large,
    # avoids padding a tiny batch up to a full 512-row tile)
    tile_r = max(16, min(tile_r, _round_up(max(n_rel, 1), 16)))
    n_rel_p = max(_round_up(max(n_rel, 1), tile_r), tile_r)

    roi_p = _pad_axis(roi_features, n_obj_p, 0).astype(bf16)

    # weights pre-transposed (in, out) in bf16; biases stay f32
    w_objc = _pad_axis(params['w_obj_cls'], obj_c_p, 1).astype(bf16)
    b_objc = _pad_axis(params['b_obj_cls'], obj_c_p, 1).astype(f32)
    w_ctxe = params['w_ctx_enc'].astype(bf16)
    b_ctxe = params['b_ctx_enc'].astype(f32)
    # post_emb split (output halves -> head / tail)
    w_head = params['w_post_emb'][:, :hidden].astype(bf16)
    w_tail = params['w_post_emb'][:, hidden:].astype(bf16)
    b_head = params['b_post_emb'][:, :hidden].astype(f32)
    b_tail = params['b_post_emb'][:, hidden:].astype(f32)

    # ---- call 1: object-side (small, single invocation, whole arrays in VMEM) ---
    vmem = pl.BlockSpec(memory_space=pltpu.MemorySpace.VMEM)
    obj_dists_p, head_rep, tail_rep = pl.pallas_call(
        _obj_side_kernel,
        out_shape=(jax.ShapeDtypeStruct((n_obj_p, obj_c_p), f32),
                   jax.ShapeDtypeStruct((n_obj_p, hidden), bf16),
                   jax.ShapeDtypeStruct((n_obj_p, hidden), bf16)),
        in_specs=[vmem] * 9,
        out_specs=(vmem, vmem, vmem),
        compiler_params=pltpu.CompilerParams(vmem_limit_bytes=48 * 1024 * 1024),
    )(roi_p, w_objc, b_objc, w_ctxe, b_ctxe, w_head, b_head, w_tail, b_tail)

    obj_dists = obj_dists_p[:n_obj, :num_obj_cls]

    # ---- call 2: rel-side, gridded over n_rel with resident single-buffered weights
    if n_rel == 0:
        # guard: empty relation batch -> no pallas_call with a zero-sized grid
        rel_dists = jnp.zeros((0, num_rel_cls), f32)
    else:
        uni_p = _pad_axis(union_features, n_rel_p, 0).astype(bf16)
        pair_p = _pad_axis(pair, n_rel_p, 0)                          # (n_rel_p, 2)

        # fused [post_cat | ctx_compress] weights, split along the 2H input axis
        w_pcat = params['w_post_cat']
        w_ctxc = params['w_ctx_compress']
        w_h_fused = jnp.concatenate(
            [_pad_axis(w_pcat[:hidden], pool_p, 1),
             _pad_axis(w_ctxc[:hidden], rel_c_p, 1)], axis=1).astype(bf16)
        w_t_fused = jnp.concatenate(
            [_pad_axis(w_pcat[hidden:], pool_p, 1),
             _pad_axis(w_ctxc[hidden:], rel_c_p, 1)], axis=1).astype(bf16)
        b_gate = _pad_axis(params['b_post_cat'], pool_p, 1).astype(f32)
        w_up = _pad_axis(params['w_up_dim'], pool_p, 1).astype(bf16)
        b_up = _pad_axis(params['b_up_dim'], pool_p, 1).astype(f32)
        w_rel = _pad_axis(_pad_axis(params['w_rel'], pool_p, 0), rel_c_p, 1).astype(bf16)
        # fold the two rel biases (always summed)
        b_rel = _pad_axis(params['b_rel'] + params['b_ctx_compress'], rel_c_p, 1).astype(f32)

        n_tiles = n_rel_p // tile_r
        fused_w = pool_p + rel_c_p

        flops = 2 * n_rel_p * (2 * n_obj_p * hidden + 2 * hidden * fused_w
                               + mlp * pool_p + pool_p * rel_c_p)
        bytes_accessed = (uni_p.size * 2 + pair_p.size * 4
                          + (head_rep.size + tail_rep.size) * 2
                          + 2 * (int(w_h_fused.size) + int(w_t_fused.size)
                                 + int(w_up.size) + int(w_rel.size))
                          + 4 * (b_gate.size + b_up.size + b_rel.size)
                          + n_rel_p * rel_c_p * 2)

        def run_rel(single_buffer):
            def tiled(shape):
                return pl.BlockSpec(shape, lambda i: (i, 0))

            def resident(shape):
                # grid-invariant operand: DMA'd once; single-buffer halves its VMEM
                if single_buffer:
                    return pl.BlockSpec(shape, lambda i: (0, 0),
                                        pipeline_mode=pl.Buffered(buffer_count=1))
                return pl.BlockSpec(shape, lambda i: (0, 0))

            in_specs = [
                tiled((tile_r, 2)),                 # fused (sidx, oidx)
                tiled((tile_r, mlp)),               # union_features
                resident((n_obj_p, hidden)),        # head_rep
                resident((n_obj_p, hidden)),        # tail_rep
                resident((hidden, fused_w)),        # [post_cat | ctx_compress] head half
                resident((hidden, fused_w)),        # [post_cat | ctx_compress] tail half
                resident((1, pool_p)),              # b_post_cat
                resident((mlp, pool_p)),            # w_up_dim
                resident((1, pool_p)),              # b_up_dim
                resident((pool_p, rel_c_p)),        # w_rel_compress
                resident((1, rel_c_p)),             # folded rel bias
            ]
            return pl.pallas_call(
                functools.partial(_rel_side_kernel, pool_p=pool_p),
                out_shape=jax.ShapeDtypeStruct((n_rel_p, rel_c_p), bf16),
                grid_spec=pltpu.PrefetchScalarGridSpec(
                    num_scalar_prefetch=0,
                    grid=(n_tiles,),
                    in_specs=in_specs,
                    out_specs=tiled((tile_r, rel_c_p)),
                ),
                compiler_params=pltpu.CompilerParams(
                    dimension_semantics=("parallel",),     # megacore-shard rel tiles (v7x)
                    vmem_limit_bytes=vmem_limit_bytes),
                cost_estimate=pl.CostEstimate(flops=flops, transcendentals=0,
                                              bytes_accessed=bytes_accessed),
            )(pair_p, uni_p, head_rep, tail_rep,
              w_h_fused, w_t_fused, b_gate, w_up, b_up, w_rel, b_rel)

        try:
            rel_dists_p = run_rel(single_buffer=True)
        except Exception:
            # Portability fallback: some builds may reject pipeline_mode=Buffered(1);
            # rerun with default double-buffered resident specs (correct, more VMEM).
            rel_dists_p = run_rel(single_buffer=False)

        rel_dists = rel_dists_p[:n_rel, :num_rel_cls].astype(f32)

    # eval-mode per-image splits
    obj_cuts, acc = [], 0
    for n in num_objs[:-1]:
        acc += n
        obj_cuts.append(acc)
    rel_cuts, acc = [], 0
    for n in num_rels[:-1]:
        acc += n
        rel_cuts.append(acc)
    return (jnp.split(obj_dists, obj_cuts, axis=0),
            jnp.split(rel_dists, rel_cuts, axis=0),
            {})


# ------------------------------------------------------------------------ params
def init_params(key, in_channels, hidden, pooling, mlp_head_dim, num_obj_cls, num_rel_cls):
    ks = jax.random.split(key, 8)

    def xavier(k, fan_in, fan_out):
        limit = (6.0 / (fan_in + fan_out)) ** 0.5
        return jax.random.uniform(k, (fan_in, fan_out), jnp.float32, -limit, limit)

    def normal(k, fan_in, fan_out, std):
        return std * jax.random.normal(k, (fan_in, fan_out), jnp.float32)

    return dict(
        # context-layer stand-in
        w_obj_cls=xavier(ks[0], in_channels, num_obj_cls),
        b_obj_cls=jnp.zeros((1, num_obj_cls), jnp.float32),
        w_ctx_enc=xavier(ks[1], in_channels, hidden),
        b_ctx_enc=jnp.zeros((1, hidden), jnp.float32),
        # post_emb: layer_init(normal, std = 10 * (1/hidden)**0.5)
        w_post_emb=normal(ks[2], hidden, 2 * hidden, 10.0 * (1.0 / hidden) ** 0.5),
        b_post_emb=jnp.zeros((1, 2 * hidden), jnp.float32),
        w_post_cat=xavier(ks[3], 2 * hidden, pooling),
        b_post_cat=jnp.zeros((1, pooling), jnp.float32),
        w_up_dim=xavier(ks[4], mlp_head_dim, pooling),
        b_up_dim=jnp.zeros((1, pooling), jnp.float32),
        w_rel=xavier(ks[5], pooling, num_rel_cls),
        b_rel=jnp.zeros((1, num_rel_cls), jnp.float32),
        w_ctx_compress=xavier(ks[6], 2 * hidden, num_rel_cls),
        b_ctx_compress=jnp.zeros((1, num_rel_cls), jnp.float32),
    )


# --------------------------------------------------------------------- reference
def _reference(roi, sidx, oidx, uni, p):
    obj_dists = roi @ p['w_obj_cls'] + p['b_obj_cls']
    edge_ctx = roi @ p['w_ctx_enc'] + p['b_ctx_enc']
    edge_rep = edge_ctx @ p['w_post_emb'] + p['b_post_emb']
    H = edge_ctx.shape[1]
    head, tail = edge_rep[:, :H], edge_rep[:, H:]
    prod = jnp.concatenate([head[sidx], tail[oidx]], axis=1)
    ctx_gate = prod @ p['w_post_cat'] + p['b_post_cat']
    visual = ctx_gate * (uni @ p['w_up_dim'] + p['b_up_dim'])
    rel = (visual @ p['w_rel'] + p['b_rel']
           + prod @ p['w_ctx_compress'] + p['b_ctx_compress'])
    return obj_dists, rel


def _assert_close(got, ref, name, rtol=5e-2, atol=1e-1):
    # bf16-operand / f32-accumulate (and bf16 rel_dists store) tolerance vs f32 ref
    err = float(jnp.max(jnp.abs(got - ref)))
    scale = float(jnp.max(jnp.abs(ref)))
    assert err <= atol + rtol * scale, f"{name}: max_err={err:.4f} scale={scale:.4f}"


# -------------------------------------------------------------------------- main
if __name__ == "__main__":
    in_channels, hidden, pooling, mlp_head_dim = 32, 32, 64, 48   # pooling != mlp -> up_dim path
    num_obj_cls, num_rel_cls = 9, 11
    num_objs = [4, 4]
    num_rels = [8, 8]
    n_obj, n_rel = sum(num_objs), sum(num_rels)

    key = jax.random.PRNGKey(0)
    kp, kr, ku, kpair = jax.random.split(key, 4)
    params = init_params(kp, in_channels, hidden, pooling, mlp_head_dim,
                         num_obj_cls, num_rel_cls)
    roi_features = jax.random.normal(kr, (n_obj, in_channels), jnp.float32)
    union_features = jax.random.normal(ku, (n_rel, mlp_head_dim), jnp.float32)
    pair_keys = jax.random.split(kpair, len(num_rels))
    rel_pair_idxs = [jax.random.randint(k, (nr, 2), 0, no, jnp.int32)
                     for k, nr, no in zip(pair_keys, num_rels, num_objs)]

    obj_list, rel_list, add_losses = trans_like_predictor_forward(
        roi_features, rel_pair_idxs, union_features, num_objs, num_rels, params)
    jax.block_until_ready((obj_list, rel_list))

    # correctness check vs plain-JAX f32 reference
    offsets = [0, num_objs[0]]
    sidx = jnp.concatenate([p[:, 0] + o for p, o in zip(rel_pair_idxs, offsets)])
    oidx = jnp.concatenate([p[:, 1] + o for p, o in zip(rel_pair_idxs, offsets)])
    ref_obj, ref_rel = _reference(roi_features, sidx, oidx, union_features, params)
    got_obj = jnp.concatenate(obj_list, axis=0)
    got_rel = jnp.concatenate(rel_list, axis=0)
    _assert_close(got_obj, ref_obj, "obj_dists")
    _assert_close(got_rel, ref_rel, "rel_dists")

    print("KERNEL_OK")
</pallas_src>

<mosaic_0001>
module attributes {stable_mosaic.version = 11 : i64} {
  func.func @_obj_side_kernel(%arg0: memref<16x32xbf16, #tpu.memory_space<vmem>>, %arg1: memref<32x128xbf16, #tpu.memory_space<vmem>>, %arg2: memref<1x128xf32, #tpu.memory_space<vmem>>, %arg3: memref<32x32xbf16, #tpu.memory_space<vmem>>, %arg4: memref<1x32xf32, #tpu.memory_space<vmem>>, %arg5: memref<32x32xbf16, #tpu.memory_space<vmem>>, %arg6: memref<1x32xf32, #tpu.memory_space<vmem>>, %arg7: memref<32x32xbf16, #tpu.memory_space<vmem>>, %arg8: memref<1x32xf32, #tpu.memory_space<vmem>>, %arg9: memref<16x128xf32, #tpu.memory_space<vmem>>, %arg10: memref<16x32xbf16, #tpu.memory_space<vmem>>, %arg11: memref<16x32xbf16, #tpu.memory_space<vmem>>) attributes {dimension_semantics = [], scalar_prefetch = 0 : i64, scratch_operands = 0 : i64, tpu.core_type = #tpu.core_type<tc>} {
    %c0 = arith.constant 0 : index
    %c0_0 = arith.constant 0 : index
    %0 = vector.load %arg0[%c0, %c0_0] : memref<16x32xbf16, #tpu.memory_space<vmem>>, vector<16x32xbf16>
    %c0_1 = arith.constant 0 : index
    %c0_2 = arith.constant 0 : index
    %1 = vector.load %arg1[%c0_1, %c0_2] : memref<32x128xbf16, #tpu.memory_space<vmem>>, vector<32x128xbf16>
    %cst = arith.constant dense<0.000000e+00> : vector<16x128xf32>
    %2 = tpu.matmul %0, %1, %cst {dimension_numbers = #tpu.dot_dimension_numbers<[1], [0], [0], [1], [0, 0, 1, 1], [], []>} : vector<16x32xbf16>, vector<32x128xbf16>, vector<16x128xf32> -> vector<16x128xf32>
    %c0_3 = arith.constant 0 : index
    %c0_4 = arith.constant 0 : index
    %3 = vector.load %arg2[%c0_3, %c0_4] : memref<1x128xf32, #tpu.memory_space<vmem>>, vector<1x128xf32>
    %4 = vector.broadcast %3 : vector<1x128xf32> to vector<16x128xf32>
    %5 = arith.addf %2, %4 : vector<16x128xf32>
    %c0_5 = arith.constant 0 : index
    %c0_6 = arith.constant 0 : index
    %6 = vector.load %arg9[%c0_5, %c0_6] : memref<16x128xf32, #tpu.memory_space<vmem>>, vector<16x128xf32>
    tpu.vector_store %arg9[%c0_5, %c0_6], %5 {strides = array<i32>} : memref<16x128xf32, #tpu.memory_space<vmem>>, vector<16x128xf32>,
    %c0_7 = arith.constant 0 : index
    %c0_8 = arith.constant 0 : index
    %7 = vector.load %arg3[%c0_7, %c0_8] : memref<32x32xbf16, #tpu.memory_space<vmem>>, vector<32x32xbf16>
    %cst_9 = arith.constant dense<0.000000e+00> : vector<16x32xf32>
    %8 = tpu.matmul %0, %7, %cst_9 {dimension_numbers = #tpu.dot_dimension_numbers<[1], [0], [0], [1], [0, 0, 1, 1], [], []>} : vector<16x32xbf16>, vector<32x32xbf16>, vector<16x32xf32> -> vector<16x32xf32>
    %c0_10 = arith.constant 0 : index
    %c0_11 = arith.constant 0 : index
    %9 = vector.load %arg4[%c0_10, %c0_11] : memref<1x32xf32, #tpu.memory_space<vmem>>, vector<1x32xf32>
    %10 = vector.broadcast %9 : vector<1x32xf32> to vector<16x32xf32>
    %11 = arith.addf %8, %10 : vector<16x32xf32>
    %12 = arith.truncf %11 : vector<16x32xf32> to vector<16x32xbf16>
    %c0_12 = arith.constant 0 : index
    %c0_13 = arith.constant 0 : index
    %13 = vector.load %arg5[%c0_12, %c0_13] : memref<32x32xbf16, #tpu.memory_space<vmem>>, vector<32x32xbf16>
    %cst_14 = arith.constant dense<0.000000e+00> : vector<16x32xf32>
    %14 = tpu.matmul %12, %13, %cst_14 {dimension_numbers = #tpu.dot_dimension_numbers<[1], [0], [0], [1], [0, 0, 1, 1], [], []>} : vector<16x32xbf16>, vector<32x32xbf16>, vector<16x32xf32> -> vector<16x32xf32>
    %c0_15 = arith.constant 0 : index
    %c0_16 = arith.constant 0 : index
    %15 = vector.load %arg6[%c0_15, %c0_16] : memref<1x32xf32, #tpu.memory_space<vmem>>, vector<1x32xf32>
    %16 = vector.broadcast %15 : vector<1x32xf32> to vector<16x32xf32>
    %17 = arith.addf %14, %16 : vector<16x32xf32>
    %c0_17 = arith.constant 0 : index
    %c0_18 = arith.constant 0 : index
    %18 = vector.load %arg7[%c0_17, %c0_18] : memref<32x32xbf16, #tpu.memory_space<vmem>>, vector<32x32xbf16>
    %cst_19 = arith.constant dense<0.000000e+00> : vector<16x32xf32>
    %19 = tpu.matmul %12, %18, %cst_19 {dimension_numbers = #tpu.dot_dimension_numbers<[1], [0], [0], [1], [0, 0, 1, 1], [], []>} : vector<16x32xbf16>, vector<32x32xbf16>, vector<16x32xf32> -> vector<16x32xf32>
    %c0_20 = arith.constant 0 : index
    %c0_21 = arith.constant 0 : index
    %20 = vector.load %arg8[%c0_20, %c0_21] : memref<1x32xf32, #tpu.memory_space<vmem>>, vector<1x32xf32>
    %21 = vector.broadcast %20 : vector<1x32xf32> to vector<16x32xf32>
    %22 = arith.addf %19, %21 : vector<16x32xf32>
    %23 = arith.truncf %17 : vector<16x32xf32> to vector<16x32xbf16>
    %c0_22 = arith.constant 0 : index
    %c0_23 = arith.constant 0 : index
    %24 = vector.load %arg10[%c0_22, %c0_23] : memref<16x32xbf16, #tpu.memory_space<vmem>>, vector<16x32xbf16>
    tpu.vector_store %arg10[%c0_22, %c0_23], %23 {strides = array<i32>} : memref<16x32xbf16, #tpu.memory_space<vmem>>, vector<16x32xbf16>,
    %25 = arith.truncf %22 : vector<16x32xf32> to vector<16x32xbf16>
    %c0_24 = arith.constant 0 : index
    %c0_25 = arith.constant 0 : index
    %26 = vector.load %arg11[%c0_24, %c0_25] : memref<16x32xbf16, #tpu.memory_space<vmem>>, vector<16x32xbf16>
    tpu.vector_store %arg11[%c0_24, %c0_25], %25 {strides = array<i32>} : memref<16x32xbf16, #tpu.memory_space<vmem>>, vector<16x32xbf16>,
    return
  }
}

</mosaic_0001>

<bundles_post_ra>
// kernel: tpu_custom_call.1
= control target key start
LH: loop header
LB: loop body
LE: loop exit
PB: predicated region body
PF: predicated region fallthrough
CT: control target
= control target key end

     0   :  { %17 = vsyncpa [#allocation3], 0  ;;  %s918_s0 = inlined_call_operand.hbm [shape: bf16[16,32], index: 0, kind: input, shape index: {}]   ;;  %s919_s1 = inlined_call_operand.hbm [shape: bf16[32,128], index: 1, kind: input, shape index: {}]   ;;  %s920_s2 = inlined_call_operand.vmem [shape: f32[1,128], index: 2, kind: input, shape index: {}]   ;;  %s921_s3 = inlined_call_operand.hbm [shape: bf16[32,32], index: 3, kind: input, shape index: {}]   ;;  %s922_s4 = inlined_call_operand.vmem [shape: f32[1,32], index: 4, kind: input, shape index: {}]   ;;  %s923_s5 = inlined_call_operand.vmem [shape: bf16[32,32], index: 5, kind: input, shape index: {}]   ;;  %s924_s6 = inlined_call_operand.vmem [shape: f32[1,32], index: 6, kind: input, shape index: {}]   ;;  %s925_s7 = inlined_call_operand.hbm [shape: bf16[32,32], index: 7, kind: input, shape index: {}]   ;;  %s926_s8 = inlined_call_operand.vmem [shape: f32[1,32], index: 8, kind: input, shape index: {}]   ;;  %s927_s9 = inlined_call_operand.hbm [shape: f32[16,128], index: 9, kind: output, shape index: {0}]   ;;  %s928_s10 = inlined_call_operand.hbm [shape: bf16[16,32], index: 10, kind: output, shape index: {1}]   ;;  %s929_s11 = inlined_call_operand.hbm [shape: bf16[16,32], index: 11, kind: output, shape index: {2}]  }
   0x1   :  { %18 = vsyncpa [#allocation6], 0 }
   0x2   :  { %19 = vsyncpa [#allocation9], 0 }
   0x3   :  { %20 = vsyncpa [#allocation4], 0 }
   0x4   :  { %21 = vsyncpa [#allocation12], 0  ;;  %s692_s17 = smov [#allocation5]   ;;  %s693_s19 = smov [#allocation2]  }
   0x5   :  { %s39_s18 = sshll.u32 %s692_s17, 4  ;;  %s27_s20 = sshll.u32 %s693_s19, 4  ;;  %s40_s18 = int_to_ptr.vmem [resolvable:$true] %s39_s18  ;;  %s765_s20 = int_to_ptr.vmem [resolvable:$true] %s27_s20 }
   0x6   :  { %s528_s23 = scalar_lea.hbm %s919_s1, 256 }
   0x7   :  { %p529_p0 = scmp.ne.s32.totalorder %s919_s1, %s528_s23  ;;  %p532_p1 = scmp.lt.u32.totalorder %s528_s23, %s919_s1 }
   0x9   :  { %p534_p2 = pnand %p532_p1, %p529_p0 }
   0xb   :  { %537 = shalt.err (!%p534_p2)
}
   0xc   :  { %s538_s28 = scalar_lea.vmem %s40_s18, 256  ;;  %p543_p4 = scmp.lt.s32.totalorder %s40_s18, %s40_s18 }
   0xd   :  { %p539_p3 = scmp.ne.s32.totalorder %s40_s18, %s538_s28  ;;  %p544_p5 = scmp.lt.s32.totalorder %s538_s28, %s538_s28 }
   0xf   :  { %p545_p6 = por %p544_p5, %p543_p4 }
  0x11   :  { %p546_p7 = pnand %p545_p6, %p539_p3 }
  0x13   :  { %549 = shalt.err (!%p546_p7)
}
  0x14   :  { %s694_s29 = smov 64   ;;  %s695_s30 = smov 4  }
  0x15   :  { %45 = dma.hbm_to_vmem [thread:$0]  %s919_s1, 256, %s40_s18, [#allocation6], %s694_s29, %s694_s29, %s695_s30  }
  0x16   :  { %s550_s16 = scalar_lea.hbm %s918_s0, 128 }
  0x17   :  { %p551_p8 = scmp.ne.s32.totalorder %s918_s0, %s550_s16  ;;  %p554_p9 = scmp.lt.u32.totalorder %s550_s16, %s918_s0 }
  0x19   :  { %p556_p10 = pnand %p554_p9, %p551_p8 }
  0x1b   :  { %559 = shalt.err (!%p556_p10)
}
  0x1c   :  { %s560_s23 = scalar_lea.vmem %s765_s20, 128  ;;  %p565_p12 = scmp.lt.s32.totalorder %s765_s20, %s765_s20 }
  0x1d   :  { %p561_p11 = scmp.ne.s32.totalorder %s765_s20, %s560_s23  ;;  %p566_p13 = scmp.lt.s32.totalorder %s560_s23, %s560_s23 }
  0x1f   :  { %p567_p0 = por %p566_p13, %p565_p12 }
  0x21   :  { %p568_p1 = pnand %p567_p0, %p561_p11 }
  0x23   :  { %571 = shalt.err (!%p568_p1)
}
  0x24   :  { %33 = dma.hbm_to_vmem [thread:$0]  %s918_s0, 128, %s765_s20, [#allocation3], %s694_s29, %s694_s29, %s695_s30  }
  0x25   :  { %s696_s24 = smov [#allocation7]   ;;  %s697_s26 = smov [#allocation8]  }
  0x26   :  { %s53_s25 = sshll.u32 %s696_s24, 4  ;;  %s71_s27 = sshll.u32 %s697_s26, 4  ;;  %s54_s25 = int_to_ptr.vmem [resolvable:$true] %s53_s25  ;;  %s802_s27 = int_to_ptr.vmem [resolvable:$true] %s71_s27 }
  0x27   :  { %s572_s13 = scalar_lea.hbm %s921_s3, 256 }
  0x28   :  { %p573_p2 = scmp.ne.s32.totalorder %s921_s3, %s572_s13  ;;  %p576_p3 = scmp.lt.u32.totalorder %s572_s13, %s921_s3 }
  0x2a   :  { %p578_p4 = pnand %p576_p3, %p573_p2 }
  0x2c   :  { %581 = shalt.err (!%p578_p4)
}
  0x2d   :  { %s582_s0 = scalar_lea.vmem %s54_s25, 256  ;;  %p587_p6 = scmp.lt.s32.totalorder %s54_s25, %s54_s25 }
  0x2e   :  { %p583_p5 = scmp.ne.s32.totalorder %s54_s25, %s582_s0  ;;  %p588_p7 = scmp.lt.s32.totalorder %s582_s0, %s582_s0 }
  0x30   :  { %p589_p8 = por %p588_p7, %p587_p6 }
  0x32   :  { %p590_p9 = pnand %p589_p8, %p583_p5 }
  0x34   :  { %593 = shalt.err (!%p590_p9)
}
  0x35   :  { %59 = dma.hbm_to_vmem [thread:$0]  %s921_s3, 256, %s54_s25, [#allocation6], %s694_s29, %s694_s29, %s695_s30  }
  0x36   :  { %s594_s23 = scalar_lea.hbm %s925_s7, 256 }
  0x37   :  { %p595_p10 = scmp.ne.s32.totalorder %s925_s7, %s594_s23  ;;  %p598_p11 = scmp.lt.u32.totalorder %s594_s23, %s925_s7 }
  0x39   :  { %p600_p12 = pnand %p598_p11, %p595_p10 }
  0x3b   :  { %603 = shalt.err (!%p600_p12)
}
  0x3c   :  { %s604_s28 = scalar_lea.vmem %s802_s27, 256  ;;  %p609_p0 = scmp.lt.s32.totalorder %s802_s27, %s802_s27 }
  0x3d   :  { %p605_p13 = scmp.ne.s32.totalorder %s802_s27, %s604_s28  ;;  %p610_p1 = scmp.lt.s32.totalorder %s604_s28, %s604_s28 }
  0x3f   :  { %p611_p2 = por %p610_p1, %p609_p0 }
  0x41   :  { %p612_p3 = pnand %p611_p2, %p605_p13 }
  0x43   :  { %615 = shalt.err (!%p612_p3)
}
  0x44   :  { %77 = dma.hbm_to_vmem [thread:$0]  %s925_s7, 256, %s802_s27, [#allocation9], %s694_s29, %s694_s29, %s695_s30  }
  0x45   :  { %682 = dma.done.wait [#allocation3], 128  }
  0x46   :  { %683 = vsyncadd [#allocation3], 4294967168 }
  0x47   :  { %684 = dma.done.wait [#allocation6], 512  }
  0x48   :  { %685 = vsyncadd [#allocation6], 4294966784 }
  0x49   :  { %686 = dma.done.wait [#allocation9], 256  }
  0x4a   :  { %687 = vsyncadd [#allocation9], 4294967040  ;;  %v698_v0 = vmov 0.0   ;;  %vm699_vm0 = vmmov 0   ;;  %v519_v1 = vld [vmem:[#allocation7] sm:$0xff]   ;;  %v520_v2 = vld [vmem:[#allocation7 + $0x8] sm:$0xff]  }
  0x4b   :  { %482 = vmatprep.subr.bf16.mxu1 %v698_v0  ;;  %486 = vmatprep.mubr.msk.bf16.mxu1 %vm699_vm0, %v698_v0  ;;  %v522_v3 = vld [vmem:[#allocation5] sm:$0xff]   ;;  %v521_v4 = vld [vmem:[#allocation2] sm:$0xff]   ;;  %v523_v5 = vld [vmem:[#allocation5 + $0x8] sm:$0xff]   ;;  %vm123_vm1 = vcmask 261120  }
  0x4c   :  { %474 = vmatprep.subr.bf16.mxu0 %v698_v0  ;;  %478 = vmatprep.mubr.msk.bf16.mxu0 %vm699_vm0, %v698_v0  ;;  %v524_v6 = vld [vmem:[%s923_s5] sm:$0xff]   ;;  %v525_v7 = vld [vmem:[#allocation8] sm:$0xff]   ;;  %v526_v8 = vld [vmem:[%s923_s5 + $0x8] sm:$0xff]  }
  0x4d   :  { %483 = vmatpush3.bf16.msra.mxu1 %v519_v1  ;;  %475 = vmatpush3.bf16.msra.mxu0 %v522_v3  ;;  %v527_v9 = vld [vmem:[#allocation8 + $0x8] sm:$0xff]  }
  0x4e   :  { %484 = vmatprep.subr.bf16.mxu1 %v698_v0  ;;  %476 = vmatprep.subr.bf16.mxu0 %v698_v0  ;;  %v442_v10 = vld [vmem:[%s922_s4] ss:$0 sm:$0xff]  ;;  %s700_s4 = smov [#allocation10]  }
  0x4f   :  { %v437_v13 = vld [vmem:[%s920_s2] ss:$0 sm:$0xff]  ;;  %s392_s5 = sshll.u32 %s700_s4, 4  ;;  %s393_s5 = int_to_ptr.vmem [resolvable:$true] %s392_s5 }
  0x50   :  { %s616_s2 = scalar_lea.vmem %s393_s5, 256  ;;  %p621_p5 = scmp.lt.s32.totalorder %s393_s5, %s393_s5 }
  0x51   :  { %485 = vmatpush3.bf16.msra.mxu1 %v520_v2  ;;  %477 = vmatpush3.bf16.msra.mxu0 %v523_v5  ;;  %p617_p4 = scmp.ne.s32.totalorder %s393_s5, %s616_s2  ;;  %p622_p6 = scmp.lt.s32.totalorder %s616_s2, %s616_s2 }
  0x52   :  { %498 = vmatprep.subr.bf16.mxu1 %v698_v0  ;;  %490 = vmatprep.subr.bf16.mxu0 %v698_v0 }
  0x53   :  { %p623_p7 = por %p622_p6, %p621_p5 }
  0x54   :  { %487 = vmatmul.mubr.msk.bf16.vlgmr.msra.gmra.mrb[0].mxu1 %vm123_vm1, %v521_v4  ;;  %479 = vmatmul.mubr.msk.bf16.vlgmr.msra.gmra.mrb[0].mxu0 %vm123_vm1, %v521_v4 }
  0x55   :  { %502 = vmatprep.mubr.msk.bf16.mxu1 %vm699_vm0, %v698_v0  ;;  %491 = vmatpush3.bf16.msra.mxu0 %v524_v6  ;;  %p624_p8 = pnand %p623_p7, %p617_p4 }
  0x56   :  { %494 = vmatprep.mubr.msk.bf16.mxu0 %vm699_vm0, %v698_v0  ;;  %492 = vmatprep.subr.bf16.mxu0 %v698_v0 }
  0x57   :  { %499 = vmatpush3.bf16.msra.mxu1 %v525_v7 }
  0x58   :  { %500 = vmatprep.subr.bf16.mxu1 %v698_v0 }
  0x59   :  { %493 = vmatpush3.bf16.msra.mxu0 %v526_v8 }
  0x5b   :  { %501 = vmatpush3.bf16.msra.mxu1 %v527_v9 }
 0x127   :  { %v227_v11 = vpop.f32.mrb[0].mxu1  ;;  %v161_v18 = vpop.f32.mrb[0].mxu0 }
 0x128   :  { %v488_v12 = vpop.f32.mrb[1].mxu1  ;;  %v228_v15 = vadd.f32 %v442_v10, %v227_v11  ;;  %v162_v19 = vadd.f32 %v437_v13, %v161_v18  ;;  %v480_v20 = vpop.f32.mrb[1].mxu0 }
 0x129   :  { %v230_v14 = vpop.f32.mrb[2].mxu1  ;;  %v164_v22 = vpop.f32.mrb[2].mxu0 }
 0x12a   :  { %v231_v16 = vadd.f32 %v442_v10, %v230_v14  ;;  %v489_v17 = vpop.f32.mrb[3].mxu1  ;;  %168 = vst [vmem:[#allocation10] sm:$0xff] %v162_v19  ;;  %v165_v23 = vadd.f32 %v437_v13, %v164_v22  ;;  %v481_v24 = vpop.f32.mrb[3].mxu0 }
 0x12c   :  { %v234_v21 = vpack.c.bf16 %v231_v16, %v228_v15  ;;  %169 = vst [vmem:[#allocation10 + $0x8] sm:$0xff] %v165_v23 }
 0x12e   :  { %495 = vmatmul.mubr.msk.bf16.vlgmr.msra.gmra.mrb[4].mxu0 %vm123_vm1, %v234_v21  ;;  %503 = vmatmul.mubr.msk.bf16.vlgmr.msra.gmra.mrb[4].mxu1 %vm123_vm1, %v234_v21 }
 0x12f   :  { %627 = shalt.err (!%p624_p8)
}
 0x130   :  { %s628_s19 = scalar_lea.hbm %s927_s9, 256 }
 0x131   :  { %p629_p9 = scmp.ne.s32.totalorder %s927_s9, %s628_s19  ;;  %p632_p10 = scmp.lt.u32.totalorder %s628_s19, %s927_s9 }
 0x133   :  { %p634_p11 = pnand %p632_p10, %p629_p9 }
 0x135   :  { %637 = shalt.err (!%p634_p11)
}
 0x136   :  { %s701_s18 = smov 128   ;;  %s702_s24 = smov 8   ;;  %v446_v25 = vld [vmem:[%s924_s6] ss:$0 sm:$0xff]  ;;  %vm374_vm2 = vcmask 257024  }
 0x137   :  { %398 = dma.vmem_to_hbm [thread:$0]  %s393_s5, 256, %s927_s9, [#allocation4], %s701_s18, %s701_s18, %s702_s24  }
 0x138   :  { %v450_v26 = vld [vmem:[%s926_s8] ss:$0 sm:$0xff]  ;;  %s703_s12 = smov [#allocation11]   ;;  %s704_s6 = smov [#allocation13]  }
 0x139   :  { %s404_s13 = sshll.u32 %s703_s12, 4  ;;  %s416_s9 = sshll.u32 %s704_s6, 4  ;;  %s405_s13 = int_to_ptr.vmem [resolvable:$true] %s404_s13  ;;  %s879_s9 = int_to_ptr.vmem [resolvable:$true] %s416_s9 }
 0x13a   :  { %s638_s8 = scalar_lea.vmem %s405_s13, 128  ;;  %p643_p13 = scmp.lt.s32.totalorder %s405_s13, %s405_s13 }
 0x13b   :  { %p639_p12 = scmp.ne.s32.totalorder %s405_s13, %s638_s8  ;;  %p644_p0 = scmp.lt.s32.totalorder %s638_s8, %s638_s8 }
 0x13d   :  { %p645_p1 = por %p644_p0, %p643_p13 }
 0x13f   :  { %p646_p2 = pnand %p645_p1, %p639_p12 }
 0x201   :  { %v295_v27 = vpop.f32.mrb[4].mxu0  ;;  %v359_v28 = vpop.f32.mrb[4].mxu1 }
 0x202   :  { %v296_v29 = vadd.f32 %v446_v25, %v295_v27  ;;  %v360_v30 = vadd.f32 %v450_v26, %v359_v28  ;;  %v496_v31 = vpop.f32.mrb[5].mxu0  ;;  %v504_v32 = vpop.f32.mrb[5].mxu1 }
 0x203   :  { %v298_v33 = vpop.f32.mrb[6].mxu0  ;;  %v362_v34 = vpop.f32.mrb[6].mxu1 }
 0x204   :  { %v458_v35 = vpack.c.bf16 %v296_v29, %v296_v29  ;;  %v460_v36 = vpack.c.bf16 %v360_v30, %v360_v30  ;;  %v299_v37 = vadd.f32 %v446_v25, %v298_v33  ;;  %v363_v38 = vadd.f32 %v450_v26, %v362_v34  ;;  %v497_v39 = vpop.f32.mrb[7].mxu0  ;;  %v505_v40 = vpop.f32.mrb[7].mxu1 }
 0x206   :  { %385 = vst.msk [vmem:[#allocation13] sm:$0xf] %vm374_vm2, %v460_v36  ;;  %375 = vst.msk [vmem:[#allocation11] sm:$0xf] %vm374_vm2, %v458_v35  ;;  %v459_v41 = vpack.c.bf16 %v299_v37, %v299_v37  ;;  %v461_v42 = vpack.c.bf16 %v363_v38, %v363_v38 }
 0x208   :  { %376 = vst.msk [vmem:[#allocation11 + $0x4] sm:$0xf] %vm374_vm2, %v459_v41  ;;  %386 = vst.msk [vmem:[#allocation13 + $0x4] sm:$0xf] %vm374_vm2, %v461_v42 }
 0x209   :  { %649 = shalt.err (!%p646_p2)
}
 0x20a   :  { %s650_s16 = scalar_lea.hbm %s928_s10, 128 }
 0x20b   :  { %p651_p3 = scmp.ne.s32.totalorder %s928_s10, %s650_s16  ;;  %p654_p4 = scmp.lt.u32.totalorder %s650_s16, %s928_s10 }
 0x20d   :  { %p656_p5 = pnand %p654_p4, %p651_p3 }
 0x20f   :  { %659 = shalt.err (!%p656_p5)
}
 0x210   :  { %410 = dma.vmem_to_hbm [thread:$0]  %s405_s13, 128, %s928_s10, [#allocation12], %s694_s29, %s694_s29, %s695_s30  }
 0x211   :  { %s660_s19 = scalar_lea.vmem %s879_s9, 128  ;;  %p665_p7 = scmp.lt.s32.totalorder %s879_s9, %s879_s9 }
 0x212   :  { %p661_p6 = scmp.ne.s32.totalorder %s879_s9, %s660_s19  ;;  %p666_p8 = scmp.lt.s32.totalorder %s660_s19, %s660_s19 }
 0x214   :  { %p667_p9 = por %p666_p8, %p665_p7 }
 0x216   :  { %p668_p10 = pnand %p667_p9, %p661_p6 }
 0x218   :  { %671 = shalt.err (!%p668_p10)
}
 0x219   :  { %s672_s23 = scalar_lea.hbm %s929_s11, 128 }
 0x21a   :  { %p673_p11 = scmp.ne.s32.totalorder %s929_s11, %s672_s23  ;;  %p676_p12 = scmp.lt.u32.totalorder %s672_s23, %s929_s11 }
 0x21c   :  { %p678_p13 = pnand %p676_p12, %p673_p11 }
 0x21e   :  { %681 = shalt.err (!%p678_p13)
}
 0x21f   :  { %422 = dma.vmem_to_hbm [thread:$0]  %s879_s9, 128, %s929_s11, [#allocation12], %s694_s29, %s694_s29, %s695_s30  }
 0x220   :  { %688 = dma.done.wait [#allocation4], 256  }
 0x221   :  { %689 = vsyncadd [#allocation4], 4294967040 }
 0x222   :  { %690 = dma.done.wait [#allocation12], 256  }
 0x223   :  { %691 = vsyncadd [#allocation12], 4294967040 }
 0x224   :  { %432 = vsyncpa [#allocation3], 1 }
 0x225   :  { %433 = vsyncpa [#allocation6], 1 }
 0x226   :  { %434 = vsyncpa [#allocation9], 1 }
 0x227   :  { %435 = vsyncpa [#allocation4], 1 }
 0x228   :  { %436 = vsyncpa [#allocation12], 1 }

</bundles_post_ra>
